<compile_context>
chip_gen: v5e
topology: v5e:2x2
jax: 0.10.0
libtpu: 0.0.40
codegen_flags: <defaults>
</compile_context>

<pallas_src>
import functools

import jax
import jax.numpy as jnp
from jax.experimental import pallas as pl
from jax.experimental.pallas import tpu as pltpu


# ----------------------------- Kernel -----------------------------
def _conv_relu_kernel(x_ref, w_ref, b_ref, out_ref, *, k, wp, out_flat):
    # x_ref  : [1, 1, Cin, SLAB]     flat row-major padded rows (lanes = spatial)
    # w_ref  : [k*k, Cout, Cin]      one [Cout, Cin] matrix per tap (resident)
    # b_ref  : [Cout, 1]             float32 bias (resident)
    # out_ref: [1, 1, Cout, OUT_FLAT]  OUT_FLAT = Th * Wp (lane-dense store)
    xv = x_ref[0, 0]                                   # [Cin, SLAB]
    cout = out_ref.shape[2]
    acc = jnp.zeros((cout, out_flat), jnp.float32)
    for dy in range(k):
        for dx in range(k):
            s = dy * wp + dx                           # static flat shift
            rhs = xv[:, s:s + out_flat]                # 2-D lane slice, no reshape
            acc = acc + jnp.dot(w_ref[dy * k + dx], rhs,
                                preferred_element_type=jnp.float32)
    acc = acc + b_ref[...]                             # bias (f32), lane broadcast
    out_ref[0, 0] = jnp.maximum(acc, 0.0).astype(out_ref.dtype)


# ----------------------------- Wrapper -----------------------------
def conv_relu(x, weight, bias, *, stride=1, padding=0, row_tile=None,
              compute_dtype=jnp.bfloat16):
    """ReLU(reflect-padded Conv2d).  x: [N,Cin,H,W] NCHW, weight: [Cout,Cin,k,k],
    bias: [Cout].  Returns [N,Cout,H_out,W_out] in `compute_dtype`."""
    if stride != 1:
        # TODO(synk): stride > 1 needs a strided lane gather of the flat slab.
        raise NotImplementedError("only stride=1 is supported")

    N, Cin, H, W = x.shape
    Cout, Cin_w, kh, kw = weight.shape
    assert Cin_w == Cin and kh == kw, "square kernels, matching Cin expected"
    k, p = kh, padding
    Hp, Wp = H + 2 * p, W + 2 * p
    H_out, W_out = Hp - k + 1, Wp - k + 1
    assert H_out > 0 and W_out > 0

    # ---- row-tile selection: biggest divisor of H_out within a VMEM budget ----
    if row_tile is None:
        budget = 4 * 1024 * 1024            # double-buffered in+out tile bytes
        row_tile = 1
        for th in range(1, H_out + 1):
            if H_out % th:
                continue
            slab = (th + k - 1) * Wp + (k - 1)
            tile_bytes = 2 * 2 * (Cin * slab + Cout * th * Wp)   # bf16, 2 buffers
            if tile_bytes <= budget:
                row_tile = th
    Th = row_tile
    assert H_out % Th == 0
    T = H_out // Th
    OUT_FLAT = Th * Wp
    SLAB = (Th + k - 1) * Wp + (k - 1)

    cdt = compute_dtype
    xc = x.astype(cdt)
    if p > 0:
        # reflect padding (== torch padding_mode='reflect'); thin XLA glue
        xc = jnp.pad(xc, ((0, 0), (0, 0), (p, p), (p, p)), mode="reflect")
    xp_flat = xc.reshape(N, Cin, Hp * Wp)
    if k > 1:
        # (k-1) trailing elements so the last tap slice of the last tile is in range
        xp_flat = jnp.pad(xp_flat, ((0, 0), (0, 0), (0, k - 1)))

    # Overlapping row-tile slabs (halo duplicated once in HBM, (k-1)/Th overhead)
    # so every grid step uses only static indexing: [N, T, Cin, SLAB].
    slabs = jnp.stack(
        [xp_flat[:, :, t * Th * Wp: t * Th * Wp + SLAB] for t in range(T)],
        axis=1)

    w_taps = jnp.transpose(weight, (2, 3, 0, 1)).reshape(k * k, Cout, Cin).astype(cdt)
    b_col = bias.reshape(Cout, 1).astype(jnp.float32)

    flops = 2 * N * H_out * Wp * Cout * Cin * k * k
    bytes_accessed = (slabs.size * slabs.dtype.itemsize
                      + w_taps.size * w_taps.dtype.itemsize
                      + b_col.size * 4
                      + N * T * Cout * OUT_FLAT * jnp.dtype(cdt).itemsize)

    kern = functools.partial(_conv_relu_kernel, k=k, wp=Wp, out_flat=OUT_FLAT)
    out_tiles = pl.pallas_call(
        kern,
        out_shape=jax.ShapeDtypeStruct((N, T, Cout, OUT_FLAT), cdt),
        grid=(N, T),
        in_specs=[
            pl.BlockSpec((1, 1, Cin, SLAB), lambda n, t: (n, t, 0, 0)),
            pl.BlockSpec((k * k, Cout, Cin), lambda n, t: (0, 0, 0)),   # resident
            pl.BlockSpec((Cout, 1), lambda n, t: (0, 0)),               # resident
        ],
        out_specs=pl.BlockSpec((1, 1, Cout, OUT_FLAT), lambda n, t: (n, t, 0, 0)),
        compiler_params=pltpu.CompilerParams(
            dimension_semantics=("parallel", "parallel"),
            vmem_limit_bytes=32 * 1024 * 1024,
        ),
        cost_estimate=pl.CostEstimate(flops=flops, transcendentals=0,
                                      bytes_accessed=bytes_accessed),
    )(slabs, w_taps, b_col)

    # Un-tile (XLA glue): [N,T,Cout,Th*Wp] -> [N,Cout,H_out,Wp] -> drop the
    # (k-1) padded-width garbage columns.
    out = out_tiles.reshape(N, T, Cout, Th, Wp)
    out = jnp.transpose(out, (0, 2, 1, 3, 4)).reshape(N, Cout, H_out, Wp)
    return out[:, :, :, :W_out]


# ----------------------------- Reference -----------------------------
def _reference(x, weight, bias, *, padding):
    # f32 math on the same (bf16-rounded) operands used by the kernel.
    xr = x.astype(jnp.bfloat16).astype(jnp.float32)
    wr = weight.astype(jnp.bfloat16).astype(jnp.float32)
    if padding > 0:
        xr = jnp.pad(xr, ((0, 0), (0, 0), (padding, padding), (padding, padding)),
                     mode="reflect")
    y = jax.lax.conv_general_dilated(
        xr, wr, window_strides=(1, 1), padding="VALID",
        dimension_numbers=("NCHW", "OIHW", "NCHW"))
    return jax.nn.relu(y + bias[None, :, None, None])


if __name__ == "__main__":
    key = jax.random.PRNGKey(0)

    # ---- ConvReLU(4 -> 4, kernel=3, stride=1, padding=1, reflect) ----
    N, Cin, Cout, H, W, K, P = 2, 4, 4, 16, 16, 3, 1
    kx, kw, kb, kx2, kw2, kb2 = jax.random.split(key, 6)
    x = jax.random.normal(kx, (N, Cin, H, W), jnp.float32)
    w = jax.random.normal(kw, (Cout, Cin, K, K), jnp.float32) * 0.1
    b = jax.random.normal(kb, (Cout,), jnp.float32) * 0.01

    out = jax.block_until_ready(conv_relu(x, w, b, stride=1, padding=P))
    assert out.shape == (N, Cout, H, W), out.shape
    ref = jax.block_until_ready(_reference(x, w, b, padding=P))
    err = float(jnp.max(jnp.abs(out.astype(jnp.float32) - ref)))
    assert err < 5e-2, f"3x3 max abs err {err}"

    # ---- ConvReLU(4 -> 8, kernel=1, stride=1, padding=0) ----
    x1 = jax.random.normal(kx2, (N, Cin, H, W), jnp.float32)
    w1 = jax.random.normal(kw2, (8, Cin, 1, 1), jnp.float32) * 0.1
    b1 = jax.random.normal(kb2, (8,), jnp.float32) * 0.01
    out1 = jax.block_until_ready(conv_relu(x1, w1, b1, stride=1, padding=0))
    assert out1.shape == (N, 8, H, W), out1.shape
    ref1 = jax.block_until_ready(_reference(x1, w1, b1, padding=0))
    err1 = float(jnp.max(jnp.abs(out1.astype(jnp.float32) - ref1)))
    assert err1 < 5e-2, f"1x1 max abs err {err1}"

    print("KERNEL_OK")
</pallas_src>

<mosaic_0001>
module attributes {stable_mosaic.version = 11 : i64} {
  func.func @_conv_relu_kernel(%arg0: i32, %arg1: i32, %arg2: memref<1x1x4x326xbf16, #tpu.memory_space<vmem>>, %arg3: memref<9x4x4xbf16, #tpu.memory_space<vmem>>, %arg4: memref<4x1xf32, #tpu.memory_space<vmem>>, %arg5: memref<1x1x4x288xbf16, #tpu.memory_space<vmem>>) attributes {dimension_semantics = [#tpu.dimension_semantics<parallel>, #tpu.dimension_semantics<parallel>], iteration_bounds = array<i64: 2, 1>, scalar_prefetch = 0 : i64, scratch_operands = 0 : i64, tpu.core_type = #tpu.core_type<tc>, window_params = [{transform_indices = @transform_0, window_bounds = array<i64: 1, 1, 4, 326>}, {pipeline_mode = #tpu.pipeline_mode<synchronous>, transform_indices = @transform_1, window_bounds = array<i64: 9, 4, 4>}, {pipeline_mode = #tpu.pipeline_mode<synchronous>, transform_indices = @transform_2, window_bounds = array<i64: 4, 1>}, {transform_indices = @transform_3, window_bounds = array<i64: 1, 1, 4, 288>}]} {
    %c0 = arith.constant 0 : index
    %c0_0 = arith.constant 0 : index
    %c0_1 = arith.constant 0 : index
    %c0_2 = arith.constant 0 : index
    %0 = vector.load %arg2[%c0, %c0_0, %c0_1, %c0_2] : memref<1x1x4x326xbf16, #tpu.memory_space<vmem>>, vector<1x1x4x326xbf16>
    %1 = vector.shape_cast %0 : vector<1x1x4x326xbf16> to vector<4x326xbf16>
    %cst = arith.constant 0.000000e+00 : f32
    %2 = vector.broadcast %cst : f32 to vector<4x288xf32>
    %3 = vector.extract_strided_slice %1 {offsets = [0, 0], sizes = [4, 288], strides = [1, 1]} : vector<4x326xbf16> to vector<4x288xbf16>
    %c0_3 = arith.constant 0 : index
    %c0_4 = arith.constant 0 : index
    %c0_5 = arith.constant 0 : index
    %4 = vector.load %arg3[%c0_3, %c0_4, %c0_5] : memref<9x4x4xbf16, #tpu.memory_space<vmem>>, vector<1x4x4xbf16>
    %5 = vector.shape_cast %4 : vector<1x4x4xbf16> to vector<4x4xbf16>
    %cst_6 = arith.constant dense<0.000000e+00> : vector<4x288xf32>
    %6 = tpu.matmul %5, %3, %cst_6 {dimension_numbers = #tpu.dot_dimension_numbers<[1], [0], [0], [1], [0, 0, 1, 1], [], []>} : vector<4x4xbf16>, vector<4x288xbf16>, vector<4x288xf32> -> vector<4x288xf32>
    %7 = arith.addf %2, %6 : vector<4x288xf32>
    %8 = vector.extract_strided_slice %1 {offsets = [0, 1], sizes = [4, 288], strides = [1, 1]} : vector<4x326xbf16> to vector<4x288xbf16>
    %c1 = arith.constant 1 : index
    %c0_7 = arith.constant 0 : index
    %c0_8 = arith.constant 0 : index
    %9 = vector.load %arg3[%c1, %c0_7, %c0_8] : memref<9x4x4xbf16, #tpu.memory_space<vmem>>, vector<1x4x4xbf16>
    %10 = vector.shape_cast %9 : vector<1x4x4xbf16> to vector<4x4xbf16>
    %cst_9 = arith.constant dense<0.000000e+00> : vector<4x288xf32>
    %11 = tpu.matmul %10, %8, %cst_9 {dimension_numbers = #tpu.dot_dimension_numbers<[1], [0], [0], [1], [0, 0, 1, 1], [], []>} : vector<4x4xbf16>, vector<4x288xbf16>, vector<4x288xf32> -> vector<4x288xf32>
    %12 = arith.addf %7, %11 : vector<4x288xf32>
    %13 = vector.extract_strided_slice %1 {offsets = [0, 2], sizes = [4, 288], strides = [1, 1]} : vector<4x326xbf16> to vector<4x288xbf16>
    %c2 = arith.constant 2 : index
    %c0_10 = arith.constant 0 : index
    %c0_11 = arith.constant 0 : index
    %14 = vector.load %arg3[%c2, %c0_10, %c0_11] : memref<9x4x4xbf16, #tpu.memory_space<vmem>>, vector<1x4x4xbf16>
    %15 = vector.shape_cast %14 : vector<1x4x4xbf16> to vector<4x4xbf16>
    %cst_12 = arith.constant dense<0.000000e+00> : vector<4x288xf32>
    %16 = tpu.matmul %15, %13, %cst_12 {dimension_numbers = #tpu.dot_dimension_numbers<[1], [0], [0], [1], [0, 0, 1, 1], [], []>} : vector<4x4xbf16>, vector<4x288xbf16>, vector<4x288xf32> -> vector<4x288xf32>
    %17 = arith.addf %12, %16 : vector<4x288xf32>
    %18 = vector.extract_strided_slice %1 {offsets = [0, 18], sizes = [4, 288], strides = [1, 1]} : vector<4x326xbf16> to vector<4x288xbf16>
    %c3 = arith.constant 3 : index
    %c0_13 = arith.constant 0 : index
    %c0_14 = arith.constant 0 : index
    %19 = vector.load %arg3[%c3, %c0_13, %c0_14] : memref<9x4x4xbf16, #tpu.memory_space<vmem>>, vector<1x4x4xbf16>
    %20 = vector.shape_cast %19 : vector<1x4x4xbf16> to vector<4x4xbf16>
    %cst_15 = arith.constant dense<0.000000e+00> : vector<4x288xf32>
    %21 = tpu.matmul %20, %18, %cst_15 {dimension_numbers = #tpu.dot_dimension_numbers<[1], [0], [0], [1], [0, 0, 1, 1], [], []>} : vector<4x4xbf16>, vector<4x288xbf16>, vector<4x288xf32> -> vector<4x288xf32>
    %22 = arith.addf %17, %21 : vector<4x288xf32>
    %23 = vector.extract_strided_slice %1 {offsets = [0, 19], sizes = [4, 288], strides = [1, 1]} : vector<4x326xbf16> to vector<4x288xbf16>
    %c4 = arith.constant 4 : index
    %c0_16 = arith.constant 0 : index
    %c0_17 = arith.constant 0 : index
    %24 = vector.load %arg3[%c4, %c0_16, %c0_17] : memref<9x4x4xbf16, #tpu.memory_space<vmem>>, vector<1x4x4xbf16>
    %25 = vector.shape_cast %24 : vector<1x4x4xbf16> to vector<4x4xbf16>
    %cst_18 = arith.constant dense<0.000000e+00> : vector<4x288xf32>
    %26 = tpu.matmul %25, %23, %cst_18 {dimension_numbers = #tpu.dot_dimension_numbers<[1], [0], [0], [1], [0, 0, 1, 1], [], []>} : vector<4x4xbf16>, vector<4x288xbf16>, vector<4x288xf32> -> vector<4x288xf32>
    %27 = arith.addf %22, %26 : vector<4x288xf32>
    %28 = vector.extract_strided_slice %1 {offsets = [0, 20], sizes = [4, 288], strides = [1, 1]} : vector<4x326xbf16> to vector<4x288xbf16>
    %c5 = arith.constant 5 : index
    %c0_19 = arith.constant 0 : index
    %c0_20 = arith.constant 0 : index
    %29 = vector.load %arg3[%c5, %c0_19, %c0_20] : memref<9x4x4xbf16, #tpu.memory_space<vmem>>, vector<1x4x4xbf16>
    %30 = vector.shape_cast %29 : vector<1x4x4xbf16> to vector<4x4xbf16>
    %cst_21 = arith.constant dense<0.000000e+00> : vector<4x288xf32>
    %31 = tpu.matmul %30, %28, %cst_21 {dimension_numbers = #tpu.dot_dimension_numbers<[1], [0], [0], [1], [0, 0, 1, 1], [], []>} : vector<4x4xbf16>, vector<4x288xbf16>, vector<4x288xf32> -> vector<4x288xf32>
    %32 = arith.addf %27, %31 : vector<4x288xf32>
    %33 = vector.extract_strided_slice %1 {offsets = [0, 36], sizes = [4, 288], strides = [1, 1]} : vector<4x326xbf16> to vector<4x288xbf16>
    %c6 = arith.constant 6 : index
    %c0_22 = arith.constant 0 : index
    %c0_23 = arith.constant 0 : index
    %34 = vector.load %arg3[%c6, %c0_22, %c0_23] : memref<9x4x4xbf16, #tpu.memory_space<vmem>>, vector<1x4x4xbf16>
    %35 = vector.shape_cast %34 : vector<1x4x4xbf16> to vector<4x4xbf16>
    %cst_24 = arith.constant dense<0.000000e+00> : vector<4x288xf32>
    %36 = tpu.matmul %35, %33, %cst_24 {dimension_numbers = #tpu.dot_dimension_numbers<[1], [0], [0], [1], [0, 0, 1, 1], [], []>} : vector<4x4xbf16>, vector<4x288xbf16>, vector<4x288xf32> -> vector<4x288xf32>
    %37 = arith.addf %32, %36 : vector<4x288xf32>
    %38 = vector.extract_strided_slice %1 {offsets = [0, 37], sizes = [4, 288], strides = [1, 1]} : vector<4x326xbf16> to vector<4x288xbf16>
    %c7 = arith.constant 7 : index
    %c0_25 = arith.constant 0 : index
    %c0_26 = arith.constant 0 : index
    %39 = vector.load %arg3[%c7, %c0_25, %c0_26] : memref<9x4x4xbf16, #tpu.memory_space<vmem>>, vector<1x4x4xbf16>
    %40 = vector.shape_cast %39 : vector<1x4x4xbf16> to vector<4x4xbf16>
    %cst_27 = arith.constant dense<0.000000e+00> : vector<4x288xf32>
    %41 = tpu.matmul %40, %38, %cst_27 {dimension_numbers = #tpu.dot_dimension_numbers<[1], [0], [0], [1], [0, 0, 1, 1], [], []>} : vector<4x4xbf16>, vector<4x288xbf16>, vector<4x288xf32> -> vector<4x288xf32>
    %42 = arith.addf %37, %41 : vector<4x288xf32>
    %43 = vector.extract_strided_slice %1 {offsets = [0, 38], sizes = [4, 288], strides = [1, 1]} : vector<4x326xbf16> to vector<4x288xbf16>
    %c8 = arith.constant 8 : index
    %c0_28 = arith.constant 0 : index
    %c0_29 = arith.constant 0 : index
    %44 = vector.load %arg3[%c8, %c0_28, %c0_29] : memref<9x4x4xbf16, #tpu.memory_space<vmem>>, vector<1x4x4xbf16>
    %45 = vector.shape_cast %44 : vector<1x4x4xbf16> to vector<4x4xbf16>
    %cst_30 = arith.constant dense<0.000000e+00> : vector<4x288xf32>
    %46 = tpu.matmul %45, %43, %cst_30 {dimension_numbers = #tpu.dot_dimension_numbers<[1], [0], [0], [1], [0, 0, 1, 1], [], []>} : vector<4x4xbf16>, vector<4x288xbf16>, vector<4x288xf32> -> vector<4x288xf32>
    %47 = arith.addf %42, %46 : vector<4x288xf32>
    %c0_31 = arith.constant 0 : index
    %c0_32 = arith.constant 0 : index
    %48 = vector.load %arg4[%c0_31, %c0_32] : memref<4x1xf32, #tpu.memory_space<vmem>>, vector<4x1xf32>
    %49 = vector.broadcast %48 : vector<4x1xf32> to vector<4x288xf32>
    %50 = arith.addf %47, %49 : vector<4x288xf32>
    %cst_33 = arith.constant 0.000000e+00 : f32
    %51 = vector.broadcast %cst_33 : f32 to vector<4x288xf32>
    %52 = arith.maximumf %50, %51 : vector<4x288xf32>
    %53 = arith.truncf %52 : vector<4x288xf32> to vector<4x288xbf16>
    %c0_34 = arith.constant 0 : index
    %c0_35 = arith.constant 0 : index
    %c0_36 = arith.constant 0 : index
    %c0_37 = arith.constant 0 : index
    %54 = vector.load %arg5[%c0_34, %c0_35, %c0_36, %c0_37] : memref<1x1x4x288xbf16, #tpu.memory_space<vmem>>, vector<1x1x4x288xbf16>
    %55 = vector.shape_cast %54 : vector<1x1x4x288xbf16> to vector<4x288xbf16>
    %56 = vector.shape_cast %53 : vector<4x288xbf16> to vector<1x1x4x288xbf16>
    tpu.vector_store %arg5[%c0_34, %c0_35, %c0_36, %c0_37], %56 {strides = array<i32>} : memref<1x1x4x288xbf16, #tpu.memory_space<vmem>>, vector<1x1x4x288xbf16>,
    return
  }
  func.func @transform_0(%arg0: i32, %arg1: i32) -> (i32, i32, i32, i32) {
    %c0_i32 = arith.constant 0 : i32
    %c0_i32_0 = arith.constant 0 : i32
    %c0_i32_1 = arith.constant 0 : i32
    return %arg0, %arg1, %c0_i32, %c0_i32_0 : i32, i32, i32, i32
  }
  func.func @transform_1(%arg0: i32, %arg1: i32) -> (i32, i32, i32) {
    %c0_i32 = arith.constant 0 : i32
    %c0_i32_0 = arith.constant 0 : i32
    %c0_i32_1 = arith.constant 0 : i32
    %c0_i32_2 = arith.constant 0 : i32
    return %c0_i32, %c0_i32_0, %c0_i32_1 : i32, i32, i32
  }
  func.func @transform_2(%arg0: i32, %arg1: i32) -> (i32, i32) {
    %c0_i32 = arith.constant 0 : i32
    %c0_i32_0 = arith.constant 0 : i32
    %c0_i32_1 = arith.constant 0 : i32
    return %c0_i32, %c0_i32_0 : i32, i32
  }
  func.func @transform_3(%arg0: i32, %arg1: i32) -> (i32, i32, i32, i32) {
    %c0_i32 = arith.constant 0 : i32
    %c0_i32_0 = arith.constant 0 : i32
    %c0_i32_1 = arith.constant 0 : i32
    return %arg0, %arg1, %c0_i32, %c0_i32_0 : i32, i32, i32, i32
  }
}

</mosaic_0001>

<bundles_post_ra>
// kernel: tpu_custom_call.1
= control target key start
LH: loop header
LB: loop body
LE: loop exit
PB: predicated region body
PF: predicated region fallthrough
CT: control target
= control target key end

     0   :  { %8 = vsyncpa [#allocation3], 0  ;;  %s1381_s0 = inlined_call_operand.vmem [shape: bf16[2,1,4,326], index: 0, kind: input, shape index: {}]   ;;  %s1382_s1 = inlined_call_operand.vmem [shape: bf16[9,4,4], index: 1, kind: input, shape index: {}]   ;;  %s1383_s2 = inlined_call_operand.vmem [shape: f32[4,1], index: 2, kind: input, shape index: {}]   ;;  %s1384_s3 = inlined_call_operand.hbm [shape: bf16[2,1,4,288], index: 3, kind: output, shape index: {}]  }
   0x1   :  { %10 = vsyncpa [#allocation3 + $0x1], 0  ;;  %s1181_s12 = smov 0   ;;  %s1183_s13 = smov 0  }
   0x2   :  { %s1185_s14 = smov 0   ;;  %s1187_s15 = smov 0  }
   0x3   :  { %s1189_s16 = smov 0   ;;  %s1191_s17 = smov 0  }
   0x4 LB: > { %s960_s18 = sadd.s32 4294967295, %s1150_s17   ;;  %s961_s19 = sadd.s32 4294967294, %s1150_s17   ;;  %s1150_s17 = sphi %s1191_s17, %s16_s17   ;;  %s1146_s16 = sphi %s1189_s16, %s1391_s16   ;;  %s1142_s15 = sphi %s1187_s15, %s1390_s15   ;;  %s1138_s14 = sphi %s1185_s14, %s1389_s14   ;;  %s1134_s13 = sphi %s1183_s13, %s1388_s13   ;;  %s1130_s12 = sphi %s1181_s12, %s1387_s12  }
   0x5   : > { %s28_s20 = sadd.s32 1, %s1146_s16  ;;  %s107_s21 = sadd.s32 1, %s1138_s14 }
   0x6   : > { %p30_p0 = scmp.ge.s32.totalorder %s28_s20, 2  ;;  %p117_p1 = scmp.ne.s32.totalorder %s1138_s14, %s1134_s13 }
   0x7   : > { %p118_p2 = scmp.eq.s32.totalorder %s960_s18, 1  ;;  %p123_p3 = scmp.ne.s32.totalorder %s1134_s13, %s1130_s12 }
   0x8   : > { %s1393_s20 = smov (%p30_p0, %s28_s20), 0  ;;  %p124_p5 = scmp.eq.s32.totalorder %s961_s19, 1 }
   0x9   : > { %p1221_p4 = por %p118_p2, %p117_p1  ;;  %s102_s23 = ssub.s32 %s1146_s16, %s1393_s20 }
   0xa   : > { %p964_p6 = scmp.ge.s32.totalorder %s1150_s17, 1  ;;  %p105_p7 = scmp.eq.s32.totalorder %s102_s23, 0 }
   0xb   : > { %p1228_p8 = por %p124_p5, %p123_p3  ;;  %p160_p9 = scmp.lt.s32.totalorder %s1150_s17, 3 }
   0xc   : > { %s1234_s25 = scalar_select %p105_p7, %s1138_s14, %s107_s21  }
   0xd   : > { %p161_p10 = pnand %p964_p6, %p160_p9 }
   0xe   : > { %p188_p11 = scmp.lt.s32.totalorder (!%p161_p10), %s1142_s15, 1  ;;  %s1152_s4 = smov (!%p161_p10), 127  }
   0xf   : > { %164 = sbr.rel (%p161_p10) target bundleno = 399 (0x18f), region = 32  ;;  %s1153_s5 = smov (!%p161_p10), 126  }
  0x10   : > { %s1154_s6 = smov (!%p161_p10), 110   ;;  %s1155_s7 = smov (!%p161_p10), 109  }
  0x11   : > { %s1156_s8 = smov (!%p161_p10), 108   ;;  %s1157_s9 = smov (!%p161_p10), 92  }
  0x12   : > { %s1158_s10 = smov (!%p161_p10), 91   ;;  %s1159_s11 = smov (!%p161_p10), 90  }
  0x13   : > { %s185_s23 = sand.u32 (!%p161_p10), 1, %s1134_s13  }
  0x14   : > { %s189_s26 = scalar_select %p188_p11, %s1142_s15, 1  ;;  %vm223_vm0 = vcmask 1041408   ;;  %v199_v29 = vld [vmem:[%s1382_s1] sm:$0x3]  ;;  %vm219_vm1 = vcmask 31744   ;;  %vm216_vm2 = vcmask 1039360  }
  0x15   : > { %v966_v37 = vld [vmem:[%s1382_s1 + $0x2] sm:$0x3]  ;;  %vm339_vm3 = vcmask 1031168   ;;  %v973_v41 = vld [vmem:[%s1382_s1 + $0x4] sm:$0x3]  ;;  %vm411_vm4 = vcmask 900096  }
  0x16   : > { %s1005_s27 = smul.u32 6, %s189_s26  ;;  %v977_v58 = vld [vmem:[%s1382_s1 + $0x6] sm:$0x3]  ;;  %vm483_vm5 = vcmask 891904   ;;  %vm555_vm6 = vcmask 883712   ;;  %vm627_vm7 = vcmask 752640  }
  0x17   : > { %vm699_vm8 = vcmask 744448   ;;  %vm771_vm9 = vcmask 736256   ;;  %s1338_s26 = smul.u32 6, %s185_s23  ;;  %vm857_vm10 = vcmask 1043458   ;;  %vm859_vm12 = vcmask 259076  }
  0x18   : > { %s196_s30 = scalar_lea.vmem %s1381_s0, %s1005_s27  ;;  %s1006_s27 = smul.u32 6, %s1142_s15  ;;  %vm858_vm11 = vmor %vm857_vm10, %vm223_vm0  ;;  %vm850_vm13 = vcmask 1045508   ;;  %vm854_vm14 = vcmask 1043456  }
  0x19   : > { %v198_v0 = vld [vmem:[%s196_s30] sm:$0x3f]  ;;  %s187_s15 = scalar_lea.vmem [#allocation2], %s1338_s26  ;;  %vm860_vm15 = vmor %vm859_vm12, %vm858_vm11 }
  0x1a   : > { %203 = vst [vmem:[#allocation1] ss:$4 sm:$0xff] %v198_v0  ;;  %s876_s30 = scalar_lea.hbm %s1384_s3, %s1006_s27 }
  0x21   : > { %v208_v1 = vld.sshfl [vmem:[#allocation1 + $0x10] sm:$0xff pattern:$0x73625140]  ;;  %v206_v2 = vld.sshfl [vmem:[#allocation1 + $0x8] sm:$0xff pattern:$0x73625140] }
  0x22   : > { %214 = vrot.lane.b32.xlu0 %v208_v1, %s1152_s4  ;;  %212 = vrot.lane.b32.xlu1 %v206_v2, %s1152_s4  ;;  %v204_v3 = vld.sshfl [vmem:[#allocation1] sm:$0xff pattern:$0x73625140] }
  0x23   : > { %272 = vst [vmem:[#allocation1] ss:$4 sm:$0xff] %v198_v0 }
  0x2a   : > { %210 = vrot.lane.b32.xlu0 %v204_v3, %s1152_s4  ;;  %v273_v4 = vld.sshfl [vmem:[#allocation1] sm:$0xff pattern:$0x73625140]  ;;  %v1241_v5 = vld.sshfl [vmem:[#allocation1 + $0x8] sm:$0xff pattern:$0x73625140] }
  0x2b   : > { %v1243_v6 = vld.sshfl [vmem:[#allocation1 + $0x10] sm:$0xff pattern:$0x73625140]  ;;  %v279_v28 = vsel %vm223_vm0, %v273_v4, 0  ;;  %v281_v44 = vsel %vm223_vm0, %v1241_v5, 0  ;;  %s878_s4 = sshll.u32 %s187_s15, 4  ;;  %s879_s4 = int_to_ptr.vmem [resolvable:$true] %s878_s4 }
  0x2c   : > { %326 = vst [vmem:[#allocation1] ss:$4 sm:$0xff] %v198_v0  ;;  %292 = vmatpush.bf16.msra.mxu3 %v279_v28  ;;  %v283_v35 = vsel %vm223_vm0, %v1243_v6, 0 }
  0x2f   : > { %970 = vmatmul.msk.bf16.vlgmr.msra.gmra.mxu3 %vm219_vm1, %v199_v29 }
  0x33   : > { %v327_v7 = vld.sshfl [vmem:[#allocation1] sm:$0xff pattern:$0x73625140]  ;;  %v329_v8 = vld.sshfl [vmem:[#allocation1 + $0x8] sm:$0xff pattern:$0x73625140] }
  0x34   : > { %333 = vrot.lane.b32.xlu1 %v327_v7, %s1153_s5  ;;  %335 = vrot.lane.b32.xlu2 %v329_v8, %s1153_s5  ;;  %v331_v9 = vld.sshfl [vmem:[#allocation1 + $0x10] sm:$0xff pattern:$0x73625140]  ;;  %v985_v8 = vld [vmem:[%s1382_s1 + $0xa] sm:$0x3] }
  0x35   : > { %398 = vst [vmem:[#allocation1] ss:$4 sm:$0xff] %v198_v0 }
  0x3c   : > { %v403_v10 = vld.sshfl [vmem:[#allocation1 + $0x10] sm:$0xff pattern:$0x73625140]  ;;  %v399_v11 = vld.sshfl [vmem:[#allocation1] sm:$0xff pattern:$0x73625140]  ;;  %337 = vrot.lane.b32.xlu2 %v331_v9, %s1153_s5 }
  0x3d   : > { %409 = vrot.lane.b32.xlu1 %v403_v10, %s1154_s6  ;;  %v401_v12 = vld.sshfl [vmem:[#allocation1 + $0x8] sm:$0xff pattern:$0x73625140]  ;;  %s880_s5 = sshll.u32 %s876_s30, 4  ;;  %s881_s5 = int_to_ptr.hbm [resolvable:$true] %s880_s5 }
  0x3e   : > { %407 = vrot.lane.b32.xlu0 %v401_v12, %s1154_s6  ;;  %470 = vst [vmem:[#allocation1] ss:$4 sm:$0xff] %v198_v0  ;;  %v981_v9 = vld [vmem:[%s1382_s1 + $0x8] sm:$0x3] }
  0x44   : > { %405 = vrot.lane.b32.xlu2 %v399_v11, %s1154_s6  ;;  %s863_s6 = scalar_lea.sflag [#allocation3], %s185_s23 }
  0x45   : > { %v475_v13 = vld.sshfl [vmem:[#allocation1 + $0x10] sm:$0xff pattern:$0x73625140]  ;;  %v473_v14 = vld.sshfl [vmem:[#allocation1 + $0x8] sm:$0xff pattern:$0x73625140] }
  0x46   : > { %481 = vrot.lane.b32.xlu0 %v475_v13, %s1155_s7  ;;  %v471_v15 = vld.sshfl [vmem:[#allocation1] sm:$0xff pattern:$0x73625140] }
  0x47   : > { %477 = vrot.lane.b32.xlu1 %v471_v15, %s1155_s7  ;;  %542 = vst [vmem:[#allocation1] ss:$4 sm:$0xff] %v198_v0 }
  0x4c   : > { %479 = vrot.lane.b32.xlu2 %v473_v14, %s1155_s7  ;;  %s1086_s7 = sshra.s32 %s881_s5, 4  ;;  %s1087_s7 = int_to_ptr.hbm [resolvable:$true] %s1086_s7 }
  0x4d   : > { %p1093_p1 = scmp.lt.s32.totalorder %s1087_s7, %s1384_s3 }
  0x4e   : > { %v545_v16 = vld.sshfl [vmem:[#allocation1 + $0x8] sm:$0xff pattern:$0x73625140]  ;;  %v543_v17 = vld.sshfl [vmem:[#allocation1] sm:$0xff pattern:$0x73625140] }
  0x4f   : > { %551 = vrot.lane.b32.xlu1 %v545_v16, %s1156_s8  ;;  %549 = vrot.lane.b32.xlu0 %v543_v17, %s1156_s8  ;;  %v547_v18 = vld.sshfl [vmem:[#allocation1 + $0x10] sm:$0xff pattern:$0x73625140] }
  0x50   : > { %614 = vst [vmem:[#allocation1] ss:$4 sm:$0xff] %v198_v0 }
  0x57   : > { %553 = vrot.lane.b32.xlu1 %v547_v18, %s1156_s8  ;;  %v619_v19 = vld.sshfl [vmem:[#allocation1 + $0x10] sm:$0xff pattern:$0x73625140]  ;;  %v617_v20 = vld.sshfl [vmem:[#allocation1 + $0x8] sm:$0xff pattern:$0x73625140] }
  0x58   : > { %623 = vrot.lane.b32.xlu0 %v617_v20, %s1157_s9  ;;  %v615_v21 = vld.sshfl [vmem:[#allocation1] sm:$0xff pattern:$0x73625140]  ;;  %s1088_s8 = scalar_lea.hbm %s1087_s7, 6 }
  0x59   : > { %621 = vrot.lane.b32.xlu2 %v615_v21, %s1157_s9  ;;  %686 = vst [vmem:[#allocation1] ss:$4 sm:$0xff] %v198_v0  ;;  %p1089_p12 = scmp.ne.s32.totalorder %s1087_s7, %s1088_s8 }
  0x5b   : > { %p1090_p13 = pnand %p1089_p12, %p1221_p4 }
  0x5d   : > { %p1091_p0 = pneg %p1090_p13 }
  0x60   : > { %v687_v22 = vld.sshfl [vmem:[#allocation1] sm:$0xff pattern:$0x73625140]  ;;  %v691_v23 = vld.sshfl [vmem:[#allocation1 + $0x10] sm:$0xff pattern:$0x73625140] }
  0x61   : > { %697 = vrot.lane.b32.xlu1 %v691_v23, %s1158_s10  ;;  %v689_v24 = vld.sshfl [vmem:[#allocation1 + $0x8] sm:$0xff pattern:$0x73625140]  ;;  %625 = vrot.lane.b32.xlu2 %v619_v19, %s1157_s9 }
  0x62   : > { %695 = vrot.lane.b32.xlu0 %v689_v24, %s1158_s10  ;;  %758 = vst [vmem:[#allocation1] ss:$4 sm:$0xff] %v198_v0 }
  0x69   : > { %v763_v25 = vld.sshfl [vmem:[#allocation1 + $0x10] sm:$0xff pattern:$0x73625140]  ;;  %v759_v26 = vld.sshfl [vmem:[#allocation1] sm:$0xff pattern:$0x73625140]  ;;  %693 = vrot.lane.b32.xlu2 %v687_v22, %s1158_s10 }
  0x6a   : > { %769 = vrot.lane.b32.xlu0 %v763_v25, %s1159_s11  ;;  %765 = vrot.lane.b32.xlu1 %v759_v26, %s1159_s11  ;;  %v761_v27 = vld.sshfl [vmem:[#allocation1 + $0x8] sm:$0xff pattern:$0x73625140] }
  0x71   : > { %767 = vrot.lane.b32.xlu2 %v761_v27, %s1159_s11  ;;  %v989_v27 = vld [vmem:[%s1382_s1 + $0xc] sm:$0x3]  ;;  %s1092_s11 = scalar_lea.hbm %s1384_s3, 12 }
  0x72   : > { %p1094_p2 = scmp.lt.s32.totalorder %s1092_s11, %s1088_s8 }
  0x74   : > { %p1095_p3 = por %p1094_p2, %p1093_p1 }
  0x76   : > { %p1096_p5 = pnand %p1095_p3, %p1091_p0 }
  0x8e   : > { %v336_v30 = vpop.permute.xlu2 %335 }
  0x94   : > { %v215_v31 = vpop.permute.xlu0 %214  ;;  %v213_v32 = vpop.permute.xlu1 %212 }
  0x95   : > { %v218_v33 = vsel %vm216_vm2, %v213_v32, %v215_v31  ;;  %v231_v34 = vsel %vm223_vm0, %v215_v31, 0 }
  0x96   : > { %v228_v36 = vsel %vm223_vm0, %v218_v33, 0  ;;  %266 = vmatpush.bf16.msra.mxu2 %v231_v34  ;;  %v338_v38 = vpop.permute.xlu2 %337 }
  0x97   : > { %253 = vmatpush.bf16.msra.mxu1 %v228_v36  ;;  %v341_v39 = vsel %vm339_vm3, %v336_v30, %v338_v38  ;;  %v352_v46 = vsel %vm223_vm0, %v338_v38, 0  ;;  %v828_v38 = vld [vmem:[%s1383_s2] sm:$0xf] }
  0x98   : > { %v349_v40 = vsel %vm223_vm0, %v341_v39, 0  ;;  %v1160_v39 = vmov 0  }
  0x99   : > { %969 = vmatmul.msk.bf16.vlgmr.msra.gmra.mxu2 %vm219_vm1, %v966_v37  ;;  %374 = vmatpush.bf16.msrb.mxu3 %v349_v40  ;;  %v993_v40 = vld [vmem:[%s1382_s1 + $0xe] sm:$0x3] }
  0x9a   : > { %968 = vmatmul.msk.bf16.vlgmr.msra.gmra.mxu1 %vm219_vm1, %v966_v37  ;;  %1071 = vset.pattern.permute.xlu0 %v1160_v39 }
  0x9b   : > { %318 = vmatpush.bf16.msrb.mxu1 %v283_v35  ;;  %831 = vperm.xlu0 %1071, %v828_v38  }
  0x9c   : > { %v211_v42 = vpop.permute.xlu0 %210  ;;  %975 = vmatmul.msk.bf16.vlgmr.msrb.gmra.mxu3 %vm219_vm1, %v973_v41 }
  0x9d   : > { %v217_v43 = vsel %vm216_vm2, %v211_v42, %v213_v32 }
  0x9e   : > { %v225_v45 = vsel %vm223_vm0, %v217_v43, 0  ;;  %v406_v50 = vpop.permute.xlu2 %405 }
  0x9f   : > { %240 = vmatpush.bf16.msra.mxu0 %v225_v45 }
  0xa2   : > { %967 = vmatmul.msk.bf16.vlgmr.msra.gmra.mxu0 %vm219_vm1, %v966_v37 }
  0xa3   : > { %305 = vmatpush.bf16.msrb.mxu0 %v281_v44 }
  0xa6   : > { %v334_v47 = vpop.permute.xlu1 %333  ;;  %v480_v59 = vpop.permute.xlu2 %479 }
  0xa7   : > { %387 = vmatpush.bf16.msra.mxu0 %v352_v46  ;;  %v340_v48 = vsel %vm339_vm3, %v334_v47, %v336_v30 }
  0xa8   : > { %v346_v49 = vsel %vm223_vm0, %v340_v48, 0 }
  0xa9   : > { %361 = vmatpush.bf16.msrb.mxu2 %v346_v49 }
  0xaa   : > { %972 = vmatmul.msk.bf16.vlgmr.msrb.gmra.mxu1 %vm219_vm1, %v199_v29 }
  0xac   : > { %974 = vmatmul.msk.bf16.vlgmr.msrb.gmra.mxu2 %vm219_vm1, %v973_v41 }
  0xaf   : > { %v410_v51 = vpop.permute.xlu1 %409 }
  0xb0   : > { %v424_v52 = vsel %vm223_vm0, %v410_v51, 0  ;;  %v408_v53 = vpop.permute.xlu0 %407 }
  0xb1   : > { %v413_v54 = vsel %vm411_vm4, %v408_v53, %v410_v51  ;;  %v412_v55 = vsel %vm411_vm4, %v406_v50, %v408_v53  ;;  %459 = vmatpush.bf16.msra.mxu3 %v424_v52 }
  0xb2   : > { %971 = vmatmul.msk.bf16.vlgmr.msrb.gmra.mxu0 %vm219_vm1, %v199_v29  ;;  %v421_v56 = vsel %vm223_vm0, %v413_v54, 0  ;;  %v418_v57 = vsel %vm223_vm0, %v412_v55, 0  ;;  %v294_v42 = vpop.f32.mrf.mxu3 }
  0xb3   : > { %433 = vmatpush.bf16.msra.mxu1 %v418_v57  ;;  %446 = vmatpush.bf16.msra.mxu2 %v421_v56  ;;  %v622_v3 = vpop.permute.xlu2 %621 }
  0xb4   : > { %980 = vmatmul.msk.bf16.vlgmr.msra.gmra.mxu3 %vm219_vm1, %v977_v58 }
  0xb8   : > { %v482_v60 = vpop.permute.xlu0 %481 }
  0xb9   : > { %v496_v61 = vsel %vm223_vm0, %v482_v60, 0  ;;  %v478_v62 = vpop.permute.xlu1 %477  ;;  %v485_v63 = vsel %vm483_vm5, %v480_v59, %v482_v60 }
  0xba   : > { %978 = vmatmul.msk.bf16.vlgmr.msra.gmra.mxu1 %vm219_vm1, %v977_v58  ;;  %v484_v0 = vsel %vm483_vm5, %v478_v62, %v480_v59  ;;  %v493_v1 = vsel %vm223_vm0, %v485_v63, 0  ;;  %531 = vmatpush.bf16.msrb.mxu2 %v496_v61  ;;  %v296_v43 = vpop.f32.mrf.mxu3 }
  0xbb   : > { %v490_v2 = vsel %vm223_vm0, %v484_v0, 0  ;;  %518 = vmatpush.bf16.msrb.mxu1 %v493_v1  ;;  %v626_v10 = vpop.permute.xlu2 %625 }
  0xbc   : > { %979 = vmatmul.msk.bf16.vlgmr.msra.gmra.mxu2 %vm219_vm1, %v977_v58  ;;  %505 = vmatpush.bf16.msrb.mxu0 %v490_v2  ;;  %v640_v20 = vsel %vm223_vm0, %v626_v10, 0 }
  0xc1   : > { %v552_v4 = vpop.permute.xlu1 %551  ;;  %v550_v5 = vpop.permute.xlu0 %549 }
  0xc2   : > { %976 = vmatmul.msk.bf16.vlgmr.msra.gmra.mxu0 %vm219_vm1, %v973_v41  ;;  %v556_v6 = vsel %vm555_vm6, %v550_v5, %v552_v4  ;;  %v997_v41 = vld [vmem:[%s1382_s1 + $0x10] sm:$0x3] }
  0xc3   : > { %v562_v7 = vsel %vm223_vm0, %v556_v6, 0  ;;  %v694_v21 = vpop.permute.xlu2 %693 }
  0xc4   : > { %577 = vmatpush.bf16.msrb.mxu3 %v562_v7 }
  0xc7   : > { %986 = vmatmul.msk.bf16.vlgmr.msrb.gmra.mxu3 %vm219_vm1, %v985_v8 }
  0xc9   : > { %v554_v11 = vpop.permute.xlu1 %553 }
  0xca   : > { %983 = vmatmul.msk.bf16.vlgmr.msrb.gmra.mxu1 %vm219_vm1, %v981_v9  ;;  %v557_v12 = vsel %vm555_vm6, %v552_v4, %v554_v11  ;;  %v568_v13 = vsel %vm223_vm0, %v554_v11, 0  ;;  %v624_v14 = vpop.permute.xlu0 %623 }
  0xcb   : > { %v565_v15 = vsel %vm223_vm0, %v557_v12, 0  ;;  %v628_v16 = vsel %vm627_vm7, %v622_v3, %v624_v14  ;;  %v629_v17 = vsel %vm627_vm7, %v624_v14, %v626_v10  ;;  %603 = vmatpush.bf16.msra.mxu1 %v568_v13  ;;  %v768_v30 = vpop.permute.xlu2 %767 }
  0xcc   : > { %984 = vmatmul.msk.bf16.vlgmr.msrb.gmra.mxu2 %vm219_vm1, %v981_v9  ;;  %v634_v18 = vsel %vm223_vm0, %v628_v16, 0  ;;  %v637_v19 = vsel %vm223_vm0, %v629_v17, 0  ;;  %590 = vmatpush.bf16.msra.mxu0 %v565_v15 }
  0xcd   : > { %649 = vmatpush.bf16.msra.mxu2 %v634_v18  ;;  %662 = vmatpush.bf16.msra.mxu3 %v637_v19 }
  0xd2   : > { %982 = vmatmul.msk.bf16.vlgmr.msrb.gmra.mxu0 %vm219_vm1, %v981_v9 }
  0xd3   : > { %675 = vmatpush.bf16.msrb.mxu0 %v640_v20  ;;  %v698_v22 = vpop.permute.xlu1 %697 }
  0xd4   : > { %v712_v23 = vsel %vm223_vm0, %v698_v22, 0  ;;  %v696_v24 = vpop.permute.xlu0 %695 }
  0xd5   : > { %v701_v25 = vsel %vm699_vm8, %v696_v24, %v698_v22  ;;  %v700_v26 = vsel %vm699_vm8, %v694_v21, %v696_v24  ;;  %747 = vmatpush.bf16.msrb.mxu3 %v712_v23 }
  0xd6   : > { %v709_v28 = vsel %vm223_vm0, %v701_v25, 0  ;;  %v706_v29 = vsel %vm223_vm0, %v700_v26, 0 }
  0xd7   : > { %991 = vmatmul.msk.bf16.vlgmr.msra.gmra.mxu3 %vm219_vm1, %v989_v27  ;;  %721 = vmatpush.bf16.msrb.mxu1 %v706_v29 }
  0xd8   : > { %734 = vmatpush.bf16.msrb.mxu2 %v709_v28 }
  0xda   : > { %988 = vmatmul.msk.bf16.vlgmr.msra.gmra.mxu1 %vm219_vm1, %v985_v8 }
  0xdc   : > { %990 = vmatmul.msk.bf16.vlgmr.msra.gmra.mxu2 %vm219_vm1, %v989_v27  ;;  %v770_v31 = vpop.permute.xlu0 %769  ;;  %v766_v32 = vpop.permute.xlu1 %765 }
  0xdd   : > { %v784_v33 = vsel %vm223_vm0, %v770_v31, 0  ;;  %v773_v34 = vsel %vm771_vm9, %v768_v30, %v770_v31  ;;  %v772_v35 = vsel %vm771_vm9, %v766_v32, %v768_v30 }
  0xde   : > { %v781_v36 = vsel %vm223_vm0, %v773_v34, 0  ;;  %819 = vmatpush.bf16.msra.mxu2 %v784_v33  ;;  %v778_v37 = vsel %vm223_vm0, %v772_v35, 0 }
  0xdf   : > { %806 = vmatpush.bf16.msra.mxu1 %v781_v36 }
  0xe2   : > { %987 = vmatmul.msk.bf16.vlgmr.msra.gmra.mxu0 %vm219_vm1, %v985_v8 }
  0xe3   : > { %793 = vmatpush.bf16.msra.mxu0 %v778_v37 }
  0xe7   : > { %996 = vmatmul.msk.bf16.vlgmr.msrb.gmra.mxu3 %vm219_vm1, %v993_v40 }
  0xea   : > { %994 = vmatmul.msk.bf16.vlgmr.msrb.gmra.mxu1 %vm219_vm1, %v993_v40 }
  0xec   : > { %995 = vmatmul.msk.bf16.vlgmr.msrb.gmra.mxu2 %vm219_vm1, %v993_v40 }
  0xf2   : > { %992 = vmatmul.msk.bf16.vlgmr.msrb.gmra.mxu0 %vm219_vm1, %v989_v27 }
  0xfa   : > { %999 = vmatmul.msk.bf16.vlgmr.msra.gmra.mxu1 %vm219_vm1, %v997_v41 }
  0xfc   : > { %1000 = vmatmul.msk.bf16.vlgmr.msra.gmra.mxu2 %vm219_vm1, %v997_v41 }
 0x102   : > { %998 = vmatmul.msk.bf16.vlgmr.msra.gmra.mxu0 %vm219_vm1, %v997_v41 }
 0x117   : > { %v255_v44 = vpop.f32.mrf.mxu1 }
 0x11c   : > { %v268_v45 = vpop.f32.mrf.mxu2 }
 0x11f   : > { %v242_v46 = vpop.f32.mrf.mxu0  ;;  %v257_v47 = vpop.f32.mrf.mxu1 }
 0x120   : > { %v295_v48 = vadd.f32 %v294_v42, %v242_v46  ;;  %v376_v49 = vpop.f32.mrf.mxu3  ;;  %v832_v47 = vpop.permute.xlu0 %831 }
 0x124   : > { %v270_v50 = vpop.f32.mrf.mxu2 }
 0x127   : > { %v244_v51 = vpop.f32.mrf.mxu0  ;;  %v320_v52 = vpop.f32.mrf.mxu1 }
 0x128   : > { %v321_v53 = vadd.f32 %v320_v52, %v268_v45  ;;  %v378_v54 = vpop.f32.mrf.mxu3 }
 0x12f   : > { %v363_v55 = vpop.f32.mrf.mxu2  ;;  %v307_v56 = vpop.f32.mrf.mxu0 }
 0x130   : > { %v393_v57 = vadd.f32 %v363_v55, %v295_v48  ;;  %v308_v58 = vadd.f32 %v307_v56, %v255_v44  ;;  %v322_v59 = vpop.f32.mrf.mxu1 }
 0x132   : > { %v394_v60 = vadd.f32 %v376_v49, %v308_v58 }
 0x137   : > { %v365_v61 = vpop.f32.mrf.mxu2  ;;  %v309_v62 = vpop.f32.mrf.mxu0 }
 0x138   : > { %v435_v63 = vpop.f32.mrf.mxu1  ;;  %v461_v0 = vpop.f32.mrf.mxu3 }
 0x139   : > { %v465_v32 = vadd.f32 %v435_v63, %v393_v57 }
 0x13f   : > { %v448_v1 = vpop.f32.mrf.mxu2  ;;  %v389_v2 = vpop.f32.mrf.mxu0 }
 0x140   : > { %v437_v3 = vpop.f32.mrf.mxu1  ;;  %v463_v4 = vpop.f32.mrf.mxu3  ;;  %v466_v27 = vadd.f32 %v448_v1, %v394_v60  ;;  %v395_v28 = vadd.f32 %v389_v2, %v321_v53 }
 0x142   : > { %v467_v33 = vadd.f32 %v461_v0, %v395_v28 }
 0x147   : > { %v450_v5 = vpop.f32.mrf.mxu2  ;;  %v391_v6 = vpop.f32.mrf.mxu0 }
 0x148   : > { %v520_v7 = vpop.f32.mrf.mxu1 }
 0x149   : > { %v538_v30 = vadd.f32 %v520_v7, %v466_v27 }
 0x14a   : > { %v579_v8 = vpop.f32.mrf.mxu3 }
 0x14f   : > { %v533_v9 = vpop.f32.mrf.mxu2  ;;  %v507_v10 = vpop.f32.mrf.mxu0 }
 0x150   : > { %v522_v11 = vpop.f32.mrf.mxu1  ;;  %v539_v35 = vadd.f32 %v533_v9, %v467_v33  ;;  %v537_v36 = vadd.f32 %v507_v10, %v465_v32 }
 0x152   : > { %v581_v12 = vpop.f32.mrf.mxu3  ;;  %v609_v42 = vadd.f32 %v579_v8, %v537_v36 }
 0x157   : > { %v535_v13 = vpop.f32.mrf.mxu2  ;;  %v509_v14 = vpop.f32.mrf.mxu0 }
 0x158   : > { %v605_v15 = vpop.f32.mrf.mxu1 }
 0x159   : > { %v611_v39 = vadd.f32 %v605_v15, %v539_v35 }
 0x15a   : > { %v664_v16 = vpop.f32.mrf.mxu3 }
 0x15f   : > { %v651_v17 = vpop.f32.mrf.mxu2  ;;  %v592_v18 = vpop.f32.mrf.mxu0 }
 0x160   : > { %v607_v19 = vpop.f32.mrf.mxu1  ;;  %v610_v34 = vadd.f32 %v592_v18, %v538_v30  ;;  %v681_v45 = vadd.f32 %v651_v17, %v609_v42 }
 0x162   : > { %v666_v20 = vpop.f32.mrf.mxu3  ;;  %v682_v40 = vadd.f32 %v664_v16, %v610_v34 }
 0x167   : > { %v653_v21 = vpop.f32.mrf.mxu2  ;;  %v594_v22 = vpop.f32.mrf.mxu0 }
 0x168   : > { %v723_v23 = vpop.f32.mrf.mxu1 }
 0x169   : > { %v753_v48 = vadd.f32 %v723_v23, %v681_v45 }
 0x16a   : > { %v749_v24 = vpop.f32.mrf.mxu3 }
 0x16f   : > { %v736_v25 = vpop.f32.mrf.mxu2  ;;  %v677_v26 = vpop.f32.mrf.mxu0 }
 0x170   : > { %v725_v29 = vpop.f32.mrf.mxu1  ;;  %v754_v43 = vadd.f32 %v736_v25, %v682_v40  ;;  %v683_v44 = vadd.f32 %v677_v26, %v611_v39 }
 0x172   : > { %v751_v31 = vpop.f32.mrf.mxu3  ;;  %v755_v49 = vadd.f32 %v749_v24, %v683_v44 }
 0x177   : > { %v738_v37 = vpop.f32.mrf.mxu2  ;;  %v679_v38 = vpop.f32.mrf.mxu0 }
 0x178   : > { %v808_v41 = vpop.f32.mrf.mxu1 }
 0x179   : > { %v826_v46 = vadd.f32 %v808_v41, %v754_v43 }
 0x17b   : > { %v835_v52 = vadd.f32 %v832_v47, %v826_v46 }
 0x17d   : > { %v838_v58 = vmax.f32 %v835_v52, 0.0 }
 0x17f   : > { %v821_v50 = vpop.f32.mrf.mxu2  ;;  %v795_v51 = vpop.f32.mrf.mxu0 }
 0x180   : > { %v827_v53 = vadd.f32 %v821_v50, %v755_v49  ;;  %v825_v54 = vadd.f32 %v795_v51, %v753_v48  ;;  %v810_v55 = vpop.f32.mrf.mxu1 }
 0x182   : > { %v836_v56 = vadd.f32 %v832_v47, %v827_v53  ;;  %v834_v57 = vadd.f32 %v832_v47, %v825_v54 }
 0x184   : > { %v839_v59 = vmax.f32 %v836_v56, 0.0  ;;  %v837_v60 = vmax.f32 %v834_v57, 0.0 }
 0x186   : > { %v841_v61 = vpack.c.bf16 %v839_v59, %v839_v59  ;;  %v840_v62 = vpack.c.bf16 %v838_v58, %v837_v60 }
 0x187   : > { %v797_v63 = vpop.f32.mrf.mxu0  ;;  %v823_v0 = vpop.f32.mrf.mxu2 }
 0x188   : > { %v845_v1 = vrot.slane %v841_v61, 4  ;;  %v846_v2 = vrot.slane %v841_v61, 6  ;;  %v844_v3 = vrot.slane %v840_v62, 2 }
 0x18a   : > { %v849_v4 = vsel %vm223_vm0, %v840_v62, %v844_v3  ;;  %v853_v5 = vsel %vm850_vm13, %v845_v1, %v846_v2 }
 0x18b   : > { %v855_v6 = vsel %vm854_vm14, %v849_v4, %v853_v5 }
 0x18c   : > { %861 = vst.msk [vmem:[%s187_s15] sm:$0x3f] %vm860_vm15, %v855_v6 }
 0x18d   : > { %1099 = shalt.err (!%p1096_p5)
}
 0x18e   : > { %1007 = dma.vmem_to_hbm [thread:$0]  (%p1221_p4), %s879_s4, 96, %s881_s5, %s863_s6  }
 0x18f PF: > { %p1013_p6 = scmp.ge.s32.totalorder %s1150_s17, 2  ;;  %s892_s21 = sand.u32 1, %s1130_s12  }
 0x190   : > { %s893_s23 = scalar_lea.sflag [#allocation3], %s892_s21 }
 0x191   : > { %p1010_p7 = pnand %p1013_p6, %p1228_p8 }
 0x193   : > { %p1011_p9 = pneg %p1010_p7 }
 0x195   : > { %1125 = dma.done.wait (%p1011_p9), %s893_s23, 96  }
 0x196   : > { %1127 = vsyncadd (%p1011_p9), %s893_s23, 4294967200  ;;  %s16_s17 = sadd.s32 1, %s1150_s17   ;;  %s1387_s12 = smov %s1134_s13 }
 0x197   : > { %p13_p10 = scmp.ge.s32.totalorder %s16_s17, 4   ;;  %s1388_s13 = smov %s1138_s14 }
 0x198   : > { %s1389_s14 = smov %s1234_s25  ;;  %s1390_s15 = smov %s1146_s16 }
 0x199   : > { %s1391_s16 = smov %s1393_s20  ;;  %15 = sbr.rel (!%p13_p10) target bundleno = 4 (0x4), region = 75 }
 0x19e   :  { %899 = vsyncpa [#allocation3], 1 }
 0x19f   :  { %901 = vsyncpa [#allocation3 + $0x1], 1 }

</bundles_post_ra>
